<compile_context>
chip_gen: v7x
topology: tpu7x:2x2x1
jax: 0.10.0
libtpu: 0.0.40
codegen_flags: <defaults>
</compile_context>

<pallas_src>
import re

import jax
import jax.numpy as jnp
from jax.experimental import pallas as pl
from jax.experimental.pallas import tpu as pltpu


# Lane widths tried in order (all multiples of 128, lane-dense last dim).
_LANE_CANDIDATES = (2048, 1024, 512, 256, 128)


def _chip_generation() -> int:
    """Best-effort TPU generation from device_kind; 0 if unknown."""
    try:
        kind = jax.devices()[0].device_kind  # e.g. "TPU v5 lite", "TPU v6e", "TPU7x"
    except Exception:
        return 0
    digits = re.findall(r"\d+", kind)
    return int(digits[0]) if digits else 0


def _gen_tuning(gen: int):
    """(per-buffer block byte target, vmem_limit_bytes or None) per generation."""
    if gen >= 7:
        # 2 refs x 2 pipeline buffers x 6 MiB = 24 MiB; raise the scoped limit
        # to 48 MiB (physical per-TC VMEM on v7x is 64 MiB) for headroom.
        return 6 * 1024 * 1024, 48 * 1024 * 1024
    if gen == 6:
        # 4 MiB blocks -> 16 MiB total, comfortably inside v6e's 32 MiB default.
        return 4 * 1024 * 1024, None
    # v5e (and unknown): 2 MiB blocks -> 8 MiB total vs 16 MiB default scoped VMEM.
    return 2 * 1024 * 1024, None


def _sublane_quantum(itemsize: int) -> int:
    """Minimum sublane multiple for the dtype: 8 (4B), 16 (2B), 32 (1B)."""
    return max(8, 32 // max(itemsize, 1))


def _make_swish_kernel(compute_dtype):
    def kernel(x_ref, o_ref):
        x = x_ref[...]
        # Skip the cast when the memory dtype already is the compute dtype
        # (no dead VPU work); otherwise compute in compute_dtype.
        xf = x if x.dtype == compute_dtype else x.astype(compute_dtype)
        # swish(x) = x * sigmoid(x); sigmoid(x) = 0.5 * (1 + tanh(x / 2)):
        # a single EUP transcendental per element, everything else on the VPU.
        y = xf * (0.5 * (1.0 + jnp.tanh(0.5 * xf)))
        o_ref[...] = y.astype(o_ref.dtype)

    return kernel


def swish(x: jax.Array) -> jax.Array:
    """Elementwise Swish on an arbitrary-shaped array via a Pallas TPU kernel."""
    orig_shape = x.shape
    dtype = x.dtype
    n = x.size
    if n == 0:
        return x

    gen = _chip_generation()
    target_block_bytes, vmem_limit = _gen_tuning(gen)
    itemsize = jnp.dtype(dtype).itemsize
    sublane = _sublane_quantum(itemsize)

    x_flat = x.reshape(-1)

    # Largest 128-divisible prefix is streamed through the kernel; any tiny
    # (<128 element) tail is computed with plain jnp (no pad/slice round trip).
    n_main = (n // 128) * 128
    if n_main == 0:
        return (x_flat * jax.nn.sigmoid(x_flat)).astype(dtype).reshape(orig_shape)

    lanes = 128
    for cand in _LANE_CANDIDATES:
        if n_main % cand == 0:
            lanes = cand
            break
    rows = n_main // lanes
    row_bytes = lanes * itemsize

    if rows * row_bytes <= target_block_bytes:
        # Single block covering the whole (rows, lanes) view; a block equal to
        # the full array dim is always legal regardless of sublane alignment.
        block_rows = rows
    else:
        block_rows = max(sublane, (target_block_bytes // row_bytes) // sublane * sublane)
        block_rows = min(block_rows, rows)

    # bf16 EUP is native on v6e/v7x; keep f32 compute on v5e and for f32 inputs.
    compute_dtype = jnp.bfloat16 if (dtype == jnp.bfloat16 and gen >= 6) else jnp.float32

    x_main = x_flat if n_main == n else x_flat[:n_main]
    x2d = x_main.reshape(rows, lanes)

    grid = (pl.cdiv(rows, block_rows),)
    # TODO(synk): expose input_output_aliases={0: 0} when the caller can donate x.
    out2d = pl.pallas_call(
        _make_swish_kernel(compute_dtype),
        out_shape=jax.ShapeDtypeStruct((rows, lanes), dtype),
        grid=grid,
        in_specs=[pl.BlockSpec((block_rows, lanes), lambda i: (i, 0))],
        out_specs=pl.BlockSpec((block_rows, lanes), lambda i: (i, 0)),
        compiler_params=pltpu.CompilerParams(
            dimension_semantics=("parallel",),
            vmem_limit_bytes=vmem_limit,
        ),
    )(x2d)

    out_main = out2d.reshape(-1)
    if n_main == n:
        return out_main.reshape(orig_shape)

    tail = x_flat[n_main:]
    out_tail = (tail * jax.nn.sigmoid(tail)).astype(dtype)
    return jnp.concatenate([out_main, out_tail]).reshape(orig_shape)


if __name__ == "__main__":
    key = jax.random.PRNGKey(0)
    # NCHW-style input consistent with conv-model usage: batch=2, C=4, H=W=16.
    x = jax.random.normal(key, (2, 4, 16, 16), dtype=jnp.float32)

    y = swish(x)
    jax.block_until_ready(y)

    # Reference check in plain JAX (matches torch: inputs * inputs.sigmoid()).
    y_ref = x * jax.nn.sigmoid(x)
    assert y.shape == x.shape and y.dtype == x.dtype
    assert jnp.allclose(y, y_ref, atol=1e-5, rtol=1e-5)

    print("KERNEL_OK")
</pallas_src>

<mosaic_0001>
module attributes {stable_mosaic.version = 11 : i64} {
  func.func @kernel(%arg0: i32, %arg1: memref<1x2048xf32, #tpu.memory_space<vmem>>, %arg2: memref<1x2048xf32, #tpu.memory_space<vmem>>) attributes {dimension_semantics = [#tpu.dimension_semantics<parallel>], iteration_bounds = array<i64: 1>, scalar_prefetch = 0 : i64, scratch_operands = 0 : i64, tpu.core_type = #tpu.core_type<tc>, window_params = [{transform_indices = @transform_0, window_bounds = array<i64: 1, 2048>}, {transform_indices = @transform_1, window_bounds = array<i64: 1, 2048>}]} {
    %c0 = arith.constant 0 : index
    %c0_0 = arith.constant 0 : index
    %0 = vector.load %arg1[%c0, %c0_0] : memref<1x2048xf32, #tpu.memory_space<vmem>>, vector<1x2048xf32>
    %cst = arith.constant 5.000000e-01 : f32
    %1 = vector.broadcast %cst : f32 to vector<1x2048xf32>
    %2 = arith.mulf %1, %0 : vector<1x2048xf32>
    %3 = math.tanh %2 : vector<1x2048xf32>
    %cst_1 = arith.constant 1.000000e+00 : f32
    %4 = vector.broadcast %cst_1 : f32 to vector<1x2048xf32>
    %5 = arith.addf %4, %3 : vector<1x2048xf32>
    %cst_2 = arith.constant 5.000000e-01 : f32
    %6 = vector.broadcast %cst_2 : f32 to vector<1x2048xf32>
    %7 = arith.mulf %6, %5 : vector<1x2048xf32>
    %8 = arith.mulf %0, %7 : vector<1x2048xf32>
    %c0_3 = arith.constant 0 : index
    %c0_4 = arith.constant 0 : index
    %9 = vector.load %arg2[%c0_3, %c0_4] : memref<1x2048xf32, #tpu.memory_space<vmem>>, vector<1x2048xf32>
    tpu.vector_store %arg2[%c0_3, %c0_4], %8 {strides = array<i32>} : memref<1x2048xf32, #tpu.memory_space<vmem>>, vector<1x2048xf32>,
    return
  }
  func.func @transform_0(%arg0: i32) -> (i32, i32) {
    %c0_i32 = arith.constant 0 : i32
    %c0_i32_0 = arith.constant 0 : i32
    return %arg0, %c0_i32 : i32, i32
  }
  func.func @transform_1(%arg0: i32) -> (i32, i32) {
    %c0_i32 = arith.constant 0 : i32
    %c0_i32_0 = arith.constant 0 : i32
    return %arg0, %c0_i32 : i32, i32
  }
}

</mosaic_0001>

<bundles_post_ra>
// kernel: tpu_custom_call.1
= control target key start
LH: loop header
LB: loop body
LE: loop exit
PB: predicated region body
PF: predicated region fallthrough
CT: control target
= control target key end

     0   :  { %6 = vsyncpa [#allocation3], 0  ;;  %s140_s0 = inlined_call_operand.hbm [shape: f32[1,2048], index: 0, kind: input, shape index: {}]   ;;  %s141_s1 = inlined_call_operand.hbm [shape: f32[1,2048], index: 1, kind: output, shape index: {}]  }
   0x1   :  { %7 = vsyncpa [#allocation4], 0  ;;  %s104_s6 = smov [#allocation2]   ;;  %s56_s10 = scalar_lea.hbm %s140_s0, 256 }
   0x2   :  { %s14_s7 = sshll.u32 %s104_s6, 4  ;;  %p57_p0 = scmp.ne.s32.totalorder %s140_s0, %s56_s10  ;;  %s15_s7 = int_to_ptr.vmem [resolvable:$true] %s14_s7 }
   0x3   :  { %p60_p1 = scmp.lt.u32.totalorder %s56_s10, %s140_s0 }
   0x5   :  { %p62_p2 = pnand %p60_p1, %p57_p0 }
   0x7   :  { %65 = shalt.err (!%p62_p2)
}
   0x8   :  { %s66_s15 = scalar_lea.vmem %s15_s7, 256  ;;  %p71_p4 = scmp.lt.s32.totalorder %s15_s7, %s15_s7 }
   0x9   :  { %p67_p3 = scmp.ne.s32.totalorder %s15_s7, %s66_s15  ;;  %p72_p5 = scmp.lt.s32.totalorder %s66_s15, %s66_s15 }
   0xb   :  { %p73_p6 = por %p72_p5, %p71_p4 }
   0xd   :  { %p74_p7 = pnand %p73_p6, %p67_p3 }
   0xf   :  { %77 = shalt.err (!%p74_p7)
}
  0x10   :  { %17 = dma.hbm_to_vmem [thread:$0]  %s140_s0, 256, %s15_s7, [#allocation3]  }
  0x11   :  { %100 = dma.done.wait [#allocation3], 256  }
  0x12   :  { %101 = vsyncadd [#allocation3], 4294967040  ;;  %v21_v0 = vld [vmem:[#allocation2] sm:$0xff]  ;;  %v22_v1 = vld [vmem:[#allocation2 + $0x8] sm:$0xff]  ;;  %s105_s18 = smov [#allocation5]  }
  0x13   :  { %v23_v2 = vmul.f32 0.5, %v21_v0  ;;  %v24_v3 = vmul.f32 0.5, %v22_v1  ;;  %s41_s19 = sshll.u32 %s105_s18, 4  ;;  %s42_s19 = int_to_ptr.vmem [resolvable:$true] %s41_s19 }
  0x14   :  { %s78_s0 = scalar_lea.vmem %s42_s19, 256  ;;  %p83_p9 = scmp.lt.s32.totalorder %s42_s19, %s42_s19 }
  0x15   :  { %52 = vtanh.f32 %v23_v2  ;;  %p79_p8 = scmp.ne.s32.totalorder %s42_s19, %s78_s0  ;;  %p84_p10 = scmp.lt.s32.totalorder %s78_s0, %s78_s0 }
  0x16   :  { %54 = vtanh.f32 %v24_v3 }
  0x17   :  { %p85_p11 = por %p84_p10, %p83_p9 }
  0x19   :  { %p86_p12 = pnand %p85_p11, %p79_p8 }
  0x1f   :  { %v53_v4 = vpop.eup %52 }
  0x20   :  { %v55_v5 = vpop.eup %54  ;;  %v27_v6 = vadd.f32 1.0, %v53_v4 }
  0x21   :  { %v28_v7 = vadd.f32 1.0, %v55_v5 }
  0x22   :  { %v29_v8 = vmul.f32 0.5, %v27_v6 }
  0x23   :  { %v30_v9 = vmul.f32 0.5, %v28_v7 }
  0x24   :  { %v31_v10 = vmul.f32 %v29_v8, %v21_v0 }
  0x25   :  { %v32_v11 = vmul.f32 %v30_v9, %v22_v1 }
  0x26   :  { %33 = vst [vmem:[#allocation5] sm:$0xff] %v31_v10 }
  0x27   :  { %34 = vst [vmem:[#allocation5 + $0x8] sm:$0xff] %v32_v11 }
  0x28   :  { %89 = shalt.err (!%p86_p12)
}
  0x29   :  { %s90_s22 = scalar_lea.hbm %s141_s1, 256 }
  0x2a   :  { %p91_p13 = scmp.ne.s32.totalorder %s141_s1, %s90_s22  ;;  %p94_p0 = scmp.lt.u32.totalorder %s90_s22, %s141_s1 }
  0x2c   :  { %p96_p1 = pnand %p94_p0, %p91_p13 }
  0x2e   :  { %99 = shalt.err (!%p96_p1)
}
  0x2f   :  { %44 = dma.vmem_to_hbm [thread:$0]  %s42_s19, 256, %s141_s1, [#allocation4]  }
  0x30   :  { %102 = dma.done.wait [#allocation4], 256  }
  0x31   :  { %103 = vsyncadd [#allocation4], 4294967040 }
  0x32   :  { %48 = vsyncpa [#allocation3], 1 }
  0x33   :  { %49 = vsyncpa [#allocation4], 1 }

</bundles_post_ra>
